<compile_context>
chip_gen: v6e
topology: v6e:2x2x1
jax: 0.10.0
libtpu: 0.0.40
codegen_flags: <defaults>
</compile_context>

<pallas_src>
import functools

import jax
import jax.numpy as jnp
from jax.experimental import pallas as pl
from jax.experimental.pallas import tpu as pltpu


def _round_up(v, m):
    return ((v + m - 1) // m) * m


def _bbb_linear_kernel(x_ref, wmu_ref, wsig2_ref, bmu_ref, bsig2_ref, eps_ref,
                       out_ref, acc_mu, acc_var):
    k = pl.program_id(2)

    @pl.when(k == 0)
    def _init():
        acc_mu[...] = jnp.zeros_like(acc_mu)
        acc_var[...] = jnp.zeros_like(acc_var)

    # Inner K loop: pure MXU accumulate (mean path + variance path).
    x = x_ref[...]
    acc_mu[...] += jnp.dot(x, wmu_ref[...], preferred_element_type=jnp.float32)
    acc_var[...] += jnp.dot(x * x, wsig2_ref[...],
                            preferred_element_type=jnp.float32)

    @pl.when(k == pl.num_programs(2) - 1)
    def _finalize():
        act_mu = acc_mu[...] + bmu_ref[...].astype(jnp.float32)
        act_var = acc_var[...] + bsig2_ref[...].astype(jnp.float32) + 1e-16
        out = act_mu + jnp.sqrt(act_var) * eps_ref[...].astype(jnp.float32)
        out_ref[...] = out.astype(out_ref.dtype)


@functools.partial(jax.jit, static_argnames=("tm", "tn", "tk"))
def bbb_linear_forward(x, w_mu, w_rho, bias_mu, bias_rho, eps,
                       *, tm=128, tn=256, tk=512):
    """x: (B, K); w_mu/w_rho: (N, K); bias_mu/bias_rho: (N,); eps: (B, N)."""
    B, K = x.shape
    N = w_mu.shape[0]

    # Hoisted out of the kernel hot loop (done once per call, fused by XLA):
    #   numerically stable softplus -> sigma^2, and (N,K)->(K,N) transposes.
    w_mu_t = jnp.transpose(w_mu).astype(x.dtype)                         # (K, N)
    w_sig2_t = jnp.transpose(
        jnp.square(jax.nn.softplus(w_rho.astype(jnp.float32)))
    ).astype(x.dtype)                                                    # (K, N)
    b_mu = bias_mu.reshape(1, N).astype(jnp.float32)
    b_sig2 = jnp.square(jax.nn.softplus(bias_rho.astype(jnp.float32))).reshape(1, N)

    # Tile sizes (clamped for small problems) and zero-padding to tile multiples
    # so every block is (8,128)-aligned and the output is lane-dense.
    tm = min(tm, _round_up(B, 8))
    tn = min(tn, _round_up(N, 128))
    tk = min(tk, _round_up(K, 128))
    Mp, Np, Kp = _round_up(B, tm), _round_up(N, tn), _round_up(K, tk)

    def pad2(a, rows, cols):
        return jnp.pad(a, ((0, rows - a.shape[0]), (0, cols - a.shape[1])))

    x_p = pad2(x, Mp, Kp)
    wmu_p = pad2(w_mu_t, Kp, Np)
    wsig2_p = pad2(w_sig2_t, Kp, Np)
    bmu_p = pad2(b_mu, 1, Np)
    bsig2_p = pad2(b_sig2, 1, Np)
    eps_p = pad2(eps.astype(jnp.float32), Mp, Np)

    grid = (Mp // tm, Np // tn, Kp // tk)

    flops = 4 * Mp * Np * Kp                       # two M*N*K matmuls
    bytes_accessed = 4 * (Mp * Kp + 2 * Kp * Np + 2 * Mp * Np)

    out_p = pl.pallas_call(
        _bbb_linear_kernel,
        out_shape=jax.ShapeDtypeStruct((Mp, Np), x.dtype),
        grid_spec=pltpu.PrefetchScalarGridSpec(
            num_scalar_prefetch=0,
            grid=grid,
            in_specs=[
                pl.BlockSpec((tm, tk), lambda i, j, k: (i, k)),   # x
                pl.BlockSpec((tk, tn), lambda i, j, k: (k, j)),   # W_mu^T
                pl.BlockSpec((tk, tn), lambda i, j, k: (k, j)),   # sigma(W)^2 ^T
                pl.BlockSpec((1, tn), lambda i, j, k: (0, j)),    # bias_mu
                pl.BlockSpec((1, tn), lambda i, j, k: (0, j)),    # bias_sigma^2
                pl.BlockSpec((tm, tn), lambda i, j, k: (i, j)),   # eps
            ],
            out_specs=pl.BlockSpec((tm, tn), lambda i, j, k: (i, j)),
            scratch_shapes=[pltpu.VMEM((tm, tn), jnp.float32),    # acc_mu
                            pltpu.VMEM((tm, tn), jnp.float32)],   # acc_var
        ),
        compiler_params=pltpu.CompilerParams(
            dimension_semantics=("parallel", "parallel", "arbitrary")),
        cost_estimate=pl.CostEstimate(flops=flops,
                                      transcendentals=Mp * Np,
                                      bytes_accessed=bytes_accessed),
    )(x_p, wmu_p, wsig2_p, bmu_p, bsig2_p, eps_p)

    return out_p[:B, :N]


def _reference_forward(x, w_mu, w_rho, bias_mu, bias_rho, eps):
    w_sigma = jax.nn.softplus(w_rho)
    b_sigma = jax.nn.softplus(bias_rho)
    act_mu = x @ w_mu.T + bias_mu
    act_var = 1e-16 + (x * x) @ (w_sigma * w_sigma).T + b_sigma * b_sigma
    return act_mu + jnp.sqrt(act_var) * eps


if __name__ == "__main__":
    # Small, module-consistent shapes.
    batch = 8
    in_features = 32
    out_features = 16

    key = jax.random.PRNGKey(0)
    k_x, k_wmu, k_wrho, k_bmu, k_brho, k_eps = jax.random.split(key, 6)

    # Deterministic parameter init mirroring reset_parameters():
    #   W_mu ~ N(0, 0.1), W_rho ~ N(-4, 0.1), same for biases.
    x = jax.random.normal(k_x, (batch, in_features), dtype=jnp.float32)
    w_mu = 0.1 * jax.random.normal(k_wmu, (out_features, in_features), jnp.float32)
    w_rho = -4.0 + 0.1 * jax.random.normal(k_wrho, (out_features, in_features), jnp.float32)
    bias_mu = 0.1 * jax.random.normal(k_bmu, (out_features,), jnp.float32)
    bias_rho = -4.0 + 0.1 * jax.random.normal(k_brho, (out_features,), jnp.float32)
    eps = jax.random.normal(k_eps, (batch, out_features), dtype=jnp.float32)

    out = bbb_linear_forward(x, w_mu, w_rho, bias_mu, bias_rho, eps)
    out = jax.block_until_ready(out)

    ref = _reference_forward(x, w_mu, w_rho, bias_mu, bias_rho, eps)
    assert out.shape == (batch, out_features)
    assert jnp.allclose(out, ref, atol=1e-5, rtol=1e-5), "mismatch vs reference"

    # TODO(synk): kl_loss() (scalar KL reduction over parameters, only part of
    # the training objective, not the forward activation) is left in plain JAX.
    print("KERNEL_OK")
</pallas_src>

<mosaic_0001>
module attributes {stable_mosaic.version = 11 : i64} {
  func.func @_bbb_linear_kernel(%arg0: i32, %arg1: i32, %arg2: i32, %arg3: memref<8x128xf32, #tpu.memory_space<vmem>>, %arg4: memref<128x128xf32, #tpu.memory_space<vmem>>, %arg5: memref<128x128xf32, #tpu.memory_space<vmem>>, %arg6: memref<1x128xf32, #tpu.memory_space<vmem>>, %arg7: memref<1x128xf32, #tpu.memory_space<vmem>>, %arg8: memref<8x128xf32, #tpu.memory_space<vmem>>, %arg9: memref<8x128xf32, #tpu.memory_space<vmem>>, %arg10: memref<8x128xf32, #tpu.memory_space<vmem>>, %arg11: memref<8x128xf32, #tpu.memory_space<vmem>>) attributes {dimension_semantics = [#tpu.dimension_semantics<parallel>, #tpu.dimension_semantics<parallel>, #tpu.dimension_semantics<arbitrary>], iteration_bounds = array<i64: 1, 1, 1>, scalar_prefetch = 0 : i64, scratch_operands = 2 : i64, tpu.core_type = #tpu.core_type<tc>, window_params = [{transform_indices = @transform_0, window_bounds = array<i64: 8, 128>}, {transform_indices = @transform_1, window_bounds = array<i64: 128, 128>}, {transform_indices = @transform_2, window_bounds = array<i64: 128, 128>}, {transform_indices = @transform_3, window_bounds = array<i64: 1, 128>}, {transform_indices = @transform_4, window_bounds = array<i64: 1, 128>}, {transform_indices = @transform_5, window_bounds = array<i64: 8, 128>}, {transform_indices = @transform_6, window_bounds = array<i64: 8, 128>}]} {
    %c0_i32 = arith.constant 0 : i32
    %0 = arith.cmpi eq, %arg2, %c0_i32 : i32
    %1 = arith.extui %0 : i1 to i32
    %c0_i32_0 = arith.constant 0 : i32
    %2 = arith.cmpi ne, %1, %c0_i32_0 : i32
    scf.if %2 {
      %cst_17 = arith.constant 0.000000e+00 : f32
      %18 = vector.broadcast %cst_17 : f32 to vector<8x128xf32>
      %c0_18 = arith.constant 0 : index
      %c0_19 = arith.constant 0 : index
      %19 = vector.load %arg10[%c0_18, %c0_19] : memref<8x128xf32, #tpu.memory_space<vmem>>, vector<8x128xf32>
      tpu.vector_store %arg10[%c0_18, %c0_19], %18 {strides = array<i32>} : memref<8x128xf32, #tpu.memory_space<vmem>>, vector<8x128xf32>,
      %cst_20 = arith.constant 0.000000e+00 : f32
      %20 = vector.broadcast %cst_20 : f32 to vector<8x128xf32>
      %c0_21 = arith.constant 0 : index
      %c0_22 = arith.constant 0 : index
      %21 = vector.load %arg11[%c0_21, %c0_22] : memref<8x128xf32, #tpu.memory_space<vmem>>, vector<8x128xf32>
      tpu.vector_store %arg11[%c0_21, %c0_22], %20 {strides = array<i32>} : memref<8x128xf32, #tpu.memory_space<vmem>>, vector<8x128xf32>,
    } else {
    }
    %c0 = arith.constant 0 : index
    %c0_1 = arith.constant 0 : index
    %3 = vector.load %arg3[%c0, %c0_1] : memref<8x128xf32, #tpu.memory_space<vmem>>, vector<8x128xf32>
    %c0_2 = arith.constant 0 : index
    %c0_3 = arith.constant 0 : index
    %4 = vector.load %arg10[%c0_2, %c0_3] : memref<8x128xf32, #tpu.memory_space<vmem>>, vector<8x128xf32>
    %c0_4 = arith.constant 0 : index
    %c0_5 = arith.constant 0 : index
    %5 = vector.load %arg4[%c0_4, %c0_5] : memref<128x128xf32, #tpu.memory_space<vmem>>, vector<128x128xf32>
    %cst = arith.constant dense<0.000000e+00> : vector<8x128xf32>
    %6 = tpu.matmul %3, %5, %cst {dimension_numbers = #tpu.dot_dimension_numbers<[1], [0], [0], [1], [0, 0, 1, 1], [], []>} : vector<8x128xf32>, vector<128x128xf32>, vector<8x128xf32> -> vector<8x128xf32>
    %7 = arith.addf %4, %6 : vector<8x128xf32>
    %c0_6 = arith.constant 0 : index
    %c0_7 = arith.constant 0 : index
    %8 = vector.load %arg10[%c0_6, %c0_7] : memref<8x128xf32, #tpu.memory_space<vmem>>, vector<8x128xf32>
    tpu.vector_store %arg10[%c0_6, %c0_7], %7 {strides = array<i32>} : memref<8x128xf32, #tpu.memory_space<vmem>>, vector<8x128xf32>,
    %c0_8 = arith.constant 0 : index
    %c0_9 = arith.constant 0 : index
    %9 = vector.load %arg11[%c0_8, %c0_9] : memref<8x128xf32, #tpu.memory_space<vmem>>, vector<8x128xf32>
    %10 = arith.mulf %3, %3 : vector<8x128xf32>
    %c0_10 = arith.constant 0 : index
    %c0_11 = arith.constant 0 : index
    %11 = vector.load %arg5[%c0_10, %c0_11] : memref<128x128xf32, #tpu.memory_space<vmem>>, vector<128x128xf32>
    %cst_12 = arith.constant dense<0.000000e+00> : vector<8x128xf32>
    %12 = tpu.matmul %10, %11, %cst_12 {dimension_numbers = #tpu.dot_dimension_numbers<[1], [0], [0], [1], [0, 0, 1, 1], [], []>} : vector<8x128xf32>, vector<128x128xf32>, vector<8x128xf32> -> vector<8x128xf32>
    %13 = arith.addf %9, %12 : vector<8x128xf32>
    %c0_13 = arith.constant 0 : index
    %c0_14 = arith.constant 0 : index
    %14 = vector.load %arg11[%c0_13, %c0_14] : memref<8x128xf32, #tpu.memory_space<vmem>>, vector<8x128xf32>
    tpu.vector_store %arg11[%c0_13, %c0_14], %13 {strides = array<i32>} : memref<8x128xf32, #tpu.memory_space<vmem>>, vector<8x128xf32>,
    %c0_i32_15 = arith.constant 0 : i32
    %15 = arith.cmpi eq, %arg2, %c0_i32_15 : i32
    %16 = arith.extui %15 : i1 to i32
    %c0_i32_16 = arith.constant 0 : i32
    %17 = arith.cmpi ne, %16, %c0_i32_16 : i32
    scf.if %17 {
      %c0_17 = arith.constant 0 : index
      %c0_18 = arith.constant 0 : index
      %18 = vector.load %arg10[%c0_17, %c0_18] : memref<8x128xf32, #tpu.memory_space<vmem>>, vector<8x128xf32>
      %c0_19 = arith.constant 0 : index
      %c0_20 = arith.constant 0 : index
      %19 = vector.load %arg6[%c0_19, %c0_20] : memref<1x128xf32, #tpu.memory_space<vmem>>, vector<1x128xf32>
      %20 = vector.broadcast %19 : vector<1x128xf32> to vector<8x128xf32>
      %21 = arith.addf %18, %20 : vector<8x128xf32>
      %c0_21 = arith.constant 0 : index
      %c0_22 = arith.constant 0 : index
      %22 = vector.load %arg11[%c0_21, %c0_22] : memref<8x128xf32, #tpu.memory_space<vmem>>, vector<8x128xf32>
      %c0_23 = arith.constant 0 : index
      %c0_24 = arith.constant 0 : index
      %23 = vector.load %arg7[%c0_23, %c0_24] : memref<1x128xf32, #tpu.memory_space<vmem>>, vector<1x128xf32>
      %24 = vector.broadcast %23 : vector<1x128xf32> to vector<8x128xf32>
      %25 = arith.addf %22, %24 : vector<8x128xf32>
      %cst_25 = arith.constant 1.000000e-16 : f32
      %26 = vector.broadcast %cst_25 : f32 to vector<8x128xf32>
      %27 = arith.addf %25, %26 : vector<8x128xf32>
      %28 = math.sqrt %27 : vector<8x128xf32>
      %c0_26 = arith.constant 0 : index
      %c0_27 = arith.constant 0 : index
      %29 = vector.load %arg8[%c0_26, %c0_27] : memref<8x128xf32, #tpu.memory_space<vmem>>, vector<8x128xf32>
      %30 = arith.mulf %28, %29 : vector<8x128xf32>
      %31 = arith.addf %21, %30 : vector<8x128xf32>
      %c0_28 = arith.constant 0 : index
      %c0_29 = arith.constant 0 : index
      %32 = vector.load %arg9[%c0_28, %c0_29] : memref<8x128xf32, #tpu.memory_space<vmem>>, vector<8x128xf32>
      tpu.vector_store %arg9[%c0_28, %c0_29], %31 {strides = array<i32>} : memref<8x128xf32, #tpu.memory_space<vmem>>, vector<8x128xf32>,
    } else {
    }
    return
  }
  func.func @transform_0(%arg0: i32, %arg1: i32, %arg2: i32) -> (i32, i32) {
    %c0_i32 = arith.constant 0 : i32
    return %arg0, %arg2 : i32, i32
  }
  func.func @transform_1(%arg0: i32, %arg1: i32, %arg2: i32) -> (i32, i32) {
    %c0_i32 = arith.constant 0 : i32
    return %arg2, %arg1 : i32, i32
  }
  func.func @transform_2(%arg0: i32, %arg1: i32, %arg2: i32) -> (i32, i32) {
    %c0_i32 = arith.constant 0 : i32
    return %arg2, %arg1 : i32, i32
  }
  func.func @transform_3(%arg0: i32, %arg1: i32, %arg2: i32) -> (i32, i32) {
    %c0_i32 = arith.constant 0 : i32
    %c0_i32_0 = arith.constant 0 : i32
    return %c0_i32, %arg1 : i32, i32
  }
  func.func @transform_4(%arg0: i32, %arg1: i32, %arg2: i32) -> (i32, i32) {
    %c0_i32 = arith.constant 0 : i32
    %c0_i32_0 = arith.constant 0 : i32
    return %c0_i32, %arg1 : i32, i32
  }
  func.func @transform_5(%arg0: i32, %arg1: i32, %arg2: i32) -> (i32, i32) {
    %c0_i32 = arith.constant 0 : i32
    return %arg0, %arg1 : i32, i32
  }
  func.func @transform_6(%arg0: i32, %arg1: i32, %arg2: i32) -> (i32, i32) {
    %c0_i32 = arith.constant 0 : i32
    return %arg0, %arg1 : i32, i32
  }
}

</mosaic_0001>

<bundles_post_ra>
// kernel: bbb_linear_forward.1
= control target key start
LH: loop header
LB: loop body
LE: loop exit
PB: predicated region body
PF: predicated region fallthrough
CT: control target
= control target key end

     0   :  { %v390_v1 = vmov 0.0   ;;  %vm391_vm0 = vmmov 0   ;;  %s573_s0 = inlined_call_operand.vmem [shape: f32[8,128], index: 0, kind: input, shape index: {}]   ;;  %s574_s1 = inlined_call_operand.vmem [shape: f32[128,128], index: 1, kind: input, shape index: {}]   ;;  %s575_s2 = inlined_call_operand.vmem [shape: f32[128,128], index: 2, kind: input, shape index: {}]   ;;  %s576_s3 = inlined_call_operand.vmem [shape: f32[1,128], index: 3, kind: input, shape index: {}]   ;;  %s577_s4 = inlined_call_operand.vmem [shape: f32[1,128], index: 4, kind: input, shape index: {}]   ;;  %s578_s5 = inlined_call_operand.vmem [shape: f32[8,128], index: 5, kind: input, shape index: {}]   ;;  %s579_s6 = inlined_call_operand.hbm [shape: f32[8,128], index: 6, kind: output, shape index: {}]  }
   0x1   :  { %v137_v0 = vld [vmem:[%s575_s2 + $0x78] sm:$0xff]  ;;  %328 = vmatprep.subr.mxu1 %v390_v1  ;;  %v136_v2 = vld [vmem:[%s575_s2 + $0x70] sm:$0xff]  ;;  %293 = vmatprep.subr.mxu0 %v390_v1  ;;  %v135_v3 = vld [vmem:[%s575_s2 + $0x68] sm:$0xff] }
   0x2   :  { %329 = vmatpush3.msra.mxu1 %v137_v0  ;;  %360 = vmatprep.mubr.msk.f32.mxu1 %vm391_vm0, %v390_v1  ;;  %v47_v4 = vld [vmem:[%s574_s1 + $0x78] sm:$0xff]  ;;  %v46_v5 = vld [vmem:[%s574_s1 + $0x70] sm:$0xff]  ;;  %v134_v6 = vld [vmem:[%s575_s2 + $0x60] sm:$0xff] }
   0x3   :  { %330 = vmatprep.subr.mxu1 %v390_v1  ;;  %325 = vmatprep.mubr.msk.f32.mxu0 %vm391_vm0, %v390_v1  ;;  %v45_v7 = vld [vmem:[%s574_s1 + $0x68] sm:$0xff]  ;;  %v133_v8 = vld [vmem:[%s575_s2 + $0x58] sm:$0xff]  ;;  %v44_v9 = vld [vmem:[%s574_s1 + $0x60] sm:$0xff] }
   0x4   :  { %331 = vmatpush3.msra.mxu1 %v136_v2  ;;  %294 = vmatpush3.msra.mxu0 %v47_v4  ;;  %v132_v10 = vld [vmem:[%s575_s2 + $0x50] sm:$0xff]  ;;  %v43_v11 = vld [vmem:[%s574_s1 + $0x58] sm:$0xff]  ;;  %v131_v12 = vld [vmem:[%s575_s2 + $0x48] sm:$0xff] }
   0x5   :  { %332 = vmatprep.subr.mxu1 %v390_v1  ;;  %295 = vmatprep.subr.mxu0 %v390_v1  ;;  %v42_v13 = vld [vmem:[%s574_s1 + $0x50] sm:$0xff] }
   0x6   :  { %333 = vmatpush3.msra.mxu1 %v135_v3  ;;  %296 = vmatpush3.msra.mxu0 %v46_v5 }
   0x7   :  { %334 = vmatprep.subr.mxu1 %v390_v1  ;;  %297 = vmatprep.subr.mxu0 %v390_v1 }
   0x8   :  { %335 = vmatpush3.msra.mxu1 %v134_v6  ;;  %298 = vmatpush3.msra.mxu0 %v45_v7 }
   0x9   :  { %336 = vmatprep.subr.mxu1 %v390_v1  ;;  %299 = vmatprep.subr.mxu0 %v390_v1 }
   0xa   :  { %337 = vmatpush3.msra.mxu1 %v133_v8  ;;  %300 = vmatpush3.msra.mxu0 %v44_v9 }
   0xb   :  { %338 = vmatprep.subr.mxu1 %v390_v1  ;;  %301 = vmatprep.subr.mxu0 %v390_v1 }
   0xc   :  { %11 = vsyncpa [#allocation5], 0  ;;  %339 = vmatpush3.msra.mxu1 %v132_v10  ;;  %302 = vmatpush3.msra.mxu0 %v43_v11  ;;  %v130_v14 = vld [vmem:[%s575_s2 + $0x40] sm:$0xff]  ;;  %v41_v15 = vld [vmem:[%s574_s1 + $0x48] sm:$0xff] }
   0xd   :  { %340 = vmatprep.subr.mxu1 %v390_v1  ;;  %303 = vmatprep.subr.mxu0 %v390_v1  ;;  %v129_v16 = vld [vmem:[%s575_s2 + $0x38] sm:$0xff]  ;;  %v40_v17 = vld [vmem:[%s574_s1 + $0x40] sm:$0xff]  ;;  %v128_v18 = vld [vmem:[%s575_s2 + $0x30] sm:$0xff] }
   0xe   :  { %341 = vmatpush3.msra.mxu1 %v131_v12  ;;  %304 = vmatpush3.msra.mxu0 %v42_v13  ;;  %v39_v19 = vld [vmem:[%s574_s1 + $0x38] sm:$0xff]  ;;  %v127_v20 = vld [vmem:[%s575_s2 + $0x28] sm:$0xff]  ;;  %v38_v21 = vld [vmem:[%s574_s1 + $0x30] sm:$0xff] }
   0xf   :  { %342 = vmatprep.subr.mxu1 %v390_v1  ;;  %305 = vmatprep.subr.mxu0 %v390_v1  ;;  %v126_v22 = vld [vmem:[%s575_s2 + $0x20] sm:$0xff]  ;;  %v37_v23 = vld [vmem:[%s574_s1 + $0x28] sm:$0xff]  ;;  %v125_v24 = vld [vmem:[%s575_s2 + $0x18] sm:$0xff] }
  0x10   :  { %343 = vmatpush3.msra.mxu1 %v130_v14  ;;  %306 = vmatpush3.msra.mxu0 %v41_v15  ;;  %v36_v25 = vld [vmem:[%s574_s1 + $0x20] sm:$0xff]  ;;  %v124_v26 = vld [vmem:[%s575_s2 + $0x10] sm:$0xff]  ;;  %v35_v27 = vld [vmem:[%s574_s1 + $0x18] sm:$0xff] }
  0x11   :  { %344 = vmatprep.subr.mxu1 %v390_v1  ;;  %307 = vmatprep.subr.mxu0 %v390_v1  ;;  %v30_v28 = vld [vmem:[%s573_s0] sm:$0xff]  ;;  %v123_v29 = vld [vmem:[%s575_s2 + $0x8] sm:$0xff]  ;;  %v34_v30 = vld [vmem:[%s574_s1 + $0x10] sm:$0xff] }
  0x12   :  { %345 = vmatpush3.msra.mxu1 %v129_v16  ;;  %308 = vmatpush3.msra.mxu0 %v40_v17  ;;  %v122_v31 = vld [vmem:[%s575_s2] sm:$0xff]  ;;  %v121_v32 = vmul.f32 %v30_v28, %v30_v28  ;;  %v33_v33 = vld [vmem:[%s574_s1 + $0x8] sm:$0xff] }
  0x13   :  { %346 = vmatprep.subr.mxu1 %v390_v1  ;;  %309 = vmatprep.subr.mxu0 %v390_v1  ;;  %v32_v34 = vld [vmem:[%s574_s1] sm:$0xff] }
  0x14   :  { %347 = vmatpush3.msra.mxu1 %v128_v18  ;;  %310 = vmatpush3.msra.mxu0 %v39_v19  ;;  %v258_v35 = vld [vmem:[%s577_s4] ss:$0 sm:$0xff]  ;;  %s392_s4 = smov [#allocation4]  }
  0x15   :  { %348 = vmatprep.subr.mxu1 %v390_v1  ;;  %311 = vmatprep.subr.mxu0 %v390_v1  ;;  %v257_v43 = vld [vmem:[%s576_s3] ss:$0 sm:$0xff]  ;;  %s249_s18 = sshll.u32 %s392_s4, 4  ;;  %s250_s18 = int_to_ptr.vmem [resolvable:$true] %s249_s18 }
  0x16   :  { %349 = vmatpush3.msra.mxu1 %v127_v20  ;;  %312 = vmatpush3.msra.mxu0 %v38_v21  ;;  %v239_v46 = vld [vmem:[%s578_s5] sm:$0xff]  ;;  %s368_s19 = scalar_lea.vmem %s250_s18, 128  ;;  %p373_p1 = scmp.lt.s32.totalorder %s250_s18, %s250_s18 }
  0x17   :  { %350 = vmatprep.subr.mxu1 %v390_v1  ;;  %313 = vmatprep.subr.mxu0 %v390_v1  ;;  %p369_p0 = scmp.ne.s32.totalorder %s250_s18, %s368_s19  ;;  %p374_p2 = scmp.lt.s32.totalorder %s368_s19, %s368_s19 }
  0x18   :  { %351 = vmatpush3.msra.mxu1 %v126_v22  ;;  %314 = vmatpush3.msra.mxu0 %v37_v23 }
  0x19   :  { %352 = vmatprep.subr.mxu1 %v390_v1  ;;  %315 = vmatprep.subr.mxu0 %v390_v1  ;;  %p375_p3 = por %p374_p2, %p373_p1 }
  0x1a   :  { %353 = vmatpush3.msra.mxu1 %v125_v24  ;;  %316 = vmatpush3.msra.mxu0 %v36_v25 }
  0x1b   :  { %354 = vmatprep.subr.mxu1 %v390_v1  ;;  %317 = vmatprep.subr.mxu0 %v390_v1  ;;  %p376_p4 = pnand %p375_p3, %p369_p0 }
  0x1c   :  { %355 = vmatpush3.msra.mxu1 %v124_v26  ;;  %318 = vmatpush3.msra.mxu0 %v35_v27 }
  0x1d   :  { %356 = vmatprep.subr.mxu1 %v390_v1  ;;  %319 = vmatprep.subr.mxu0 %v390_v1 }
  0x1e   :  { %357 = vmatpush3.msra.mxu1 %v123_v29  ;;  %320 = vmatpush3.msra.mxu0 %v34_v30 }
  0x1f   :  { %358 = vmatprep.subr.mxu1 %v390_v1  ;;  %321 = vmatprep.subr.mxu0 %v390_v1 }
  0x20   :  { %359 = vmatpush3.msra.mxu1 %v122_v31  ;;  %322 = vmatpush3.msra.mxu0 %v33_v33 }
  0x21   :  { %361 = vmatmul.mubr.f32.vlgmr.msra.gmra.mxu1 %v121_v32  ;;  %323 = vmatprep.subr.mxu0 %v390_v1 }
  0x22   :  { %324 = vmatpush3.msra.mxu0 %v32_v34 }
  0x23   :  { %326 = vmatmul.mubr.f32.vlgmr.msra.gmra.mxu0 %v30_v28 }
  0xe1   :  { %v204_v36 = vpop.f32.mrf.mxu1 }
  0xe2   :  { %v230_v37 = vadd.f32 %v258_v35, %v204_v36 }
  0xe3   :  { %v362_v38 = vpop.f32.mrf.mxu1  ;;  %v114_v39 = vpop.f32.mrf.mxu0 }
  0xe4   :  { %v231_v40 = vadd.f32 1e-16, %v230_v37  ;;  %v221_v47 = vadd.f32 %v257_v43, %v114_v39 }
  0xe5   :  { %v327_v41 = vpop.f32.mrf.mxu0 }
  0xe6   :  { %366 = vrsqrt.f32 %v231_v40  ;;  %vm234_vm1 = vcmp.eq.f32.partialorder %v231_v40, inf  ;;  %v237_v45 = vand.u32 2147483648, %v231_v40  ;;  %vm236_vm2 = vcmp.eq.f32.partialorder %v231_v40, 0.0 }
  0xf3   :  { %v367_v42 = vpop.eup %366 }
  0xf4   :  { %v233_v44 = vmul.f32 %v367_v42, %v231_v40 }
  0xf6   :  { %v235_v48 = vsel %vm234_vm1, %v231_v40, %v233_v44 }
  0xf7   :  { %v238_v49 = vsel %vm236_vm2, %v237_v45, %v235_v48 }
  0xf8   :  { %v240_v50 = vmul.f32 %v239_v46, %v238_v49 }
  0xfa   :  { %v241_v51 = vadd.f32 %v240_v50, %v221_v47 }
  0xfc   :  { %242 = vst [vmem:[#allocation4] sm:$0xff] %v241_v51 }
  0xfd   :  { %379 = shalt.err (!%p376_p4)
}
  0xfe   :  { %252 = dma.vmem_to_hbm [thread:$0]  %s250_s18, 128, %s579_s6, [#allocation5]  }
  0xff   :  { %388 = dma.done.wait [#allocation5], 128  }
 0x100   :  { %389 = vsyncadd [#allocation5], 4294967168 }
 0x101   :  { %256 = vsyncpa [#allocation5], 1 }

</bundles_post_ra>
